<compile_context>
chip_gen: v7x
topology: tpu7x:2x2x1
jax: 0.10.0
libtpu: 0.0.40
codegen_flags: <defaults>
</compile_context>

<pallas_src>
import functools

import jax
import jax.numpy as jnp
from jax.experimental import pallas as pl
from jax.experimental.pallas import tpu as pltpu

EPS = 1e-8


def _round_up(x, m):
    return (x + m - 1) // m * m


def _round_down(x, m):
    return x // m * m


def _choose_tile(hw, c, in_bytes, mask_bytes, target_step_bytes, max_tile=65536,
                 vmem_budget=12 << 20):
    """Pick a lane-dense spatial tile (multiple of 128)."""
    # VMEM per lane: 2 pipeline buffers x (pred+target+mask) + f32 scratch accs.
    per_lane = 2 * (2 * c * in_bytes + mask_bytes) + (2 * c + 1) * 4
    cap = max(128, _round_down(vmem_budget // per_lane, 128))
    desired = target_step_bytes // max(1, 2 * c * in_bytes)
    desired = max(512, desired)
    desired = min(desired, max_tile, cap)
    desired = max(128, _round_down(desired, 128))
    hw128 = _round_up(hw, 128)
    if hw128 <= desired:           # everything fits in a single tile
        return hw128
    if hw % 128 == 0:
        # Prefer a divisor of HW (multiple of 128) near `desired`: no ragged tail.
        t = desired
        while t >= 128:
            if hw % t == 0:
                if 2 * t >= desired:
                    return t
                break
            t -= 128
    return desired


def _masked_l1_kernel(pred_ref, target_ref, mask_ref, out_ref,
                      acc_d_ref, acc_md_ref, acc_m_ref,
                      *, hw, tile, tiles_per_slice, ragged):
    s = pl.program_id(0)          # core-split slice
    t = pl.program_id(2)          # spatial tile within slice (reduction axis)

    p = pred_ref[...].astype(jnp.float32)     # (C, tile)
    q = target_ref[...].astype(jnp.float32)   # (C, tile)
    m = mask_ref[...].astype(jnp.float32)     # (1, tile) -> broadcasts over C

    d = jnp.abs(p - q)

    if ragged:
        # Zero BOTH d and m on lanes past the true spatial extent so garbage
        # read in the padded edge block never contributes to any sum.
        start = (s * tiles_per_slice + t) * tile
        lane = jax.lax.broadcasted_iota(jnp.int32, (1, tile), dimension=1)
        valid = (start + lane) < hw
        d = jnp.where(valid, d, 0.0)
        m = jnp.where(valid, m, 0.0)

    md = m * d

    @pl.when(t == 0)
    def _init():
        acc_d_ref[...] = d
        acc_md_ref[...] = md
        acc_m_ref[...] = m

    @pl.when(t > 0)
    def _accumulate():
        acc_d_ref[...] += d
        acc_md_ref[...] += md
        acc_m_ref[...] += m

    @pl.when(t == pl.num_programs(2) - 1)
    def _finalize():
        # Once-per-(slice, batch) XLU reduction; write tiny lane-dense partials.
        sum_d = jnp.sum(acc_d_ref[...])
        sum_md = jnp.sum(acc_md_ref[...])
        sum_m = jnp.sum(acc_m_ref[...])
        out_ref[0:1, :] = jnp.full((1, 128), sum_d, dtype=jnp.float32)
        out_ref[1:2, :] = jnp.full((1, 128), sum_md, dtype=jnp.float32)
        out_ref[2:3, :] = jnp.full((1, 128), sum_m, dtype=jnp.float32)


def masked_l1_loss(pred, target, mask, masked_weight=10.0, unmasked_weight=0.1,
                   target_step_bytes=2 << 20):
    """Forward pass of MaskedL1Loss.

    pred/target: (B, C, H, W); mask: (B, H, W) or (B, 1, h, w) with values in [0, 1].
    """
    # ---- glue (mirrors the PyTorch preprocessing) ----
    if mask.ndim == 3:
        mask = mask[:, None, :, :]
    B, C, H, W = pred.shape
    if mask.shape[2:] != (H, W):
        # F.interpolate(mode='bilinear', align_corners=False) == half-pixel resize
        mask = jax.image.resize(
            mask, (mask.shape[0], mask.shape[1], H, W),
            method="bilinear", antialias=False)
    # Stream the mask in the same dtype as pred (e.g. bf16) to cut HBM bytes.
    mask = mask.astype(pred.dtype)

    HW = H * W
    in_bytes = jnp.dtype(pred.dtype).itemsize
    mask_bytes = jnp.dtype(mask.dtype).itemsize
    tile = _choose_tile(HW, C, in_bytes, mask_bytes, int(target_step_bytes))
    num_tiles = -(-HW // tile)
    ragged = (HW % tile) != 0

    # Split the spatial-tile axis into 2 slices when it divides evenly so both
    # v7x TensorCores get work even for B == 1 (harmless on v5e/v6e).
    n_split = 2 if (num_tiles >= 2 and num_tiles % 2 == 0) else 1
    tiles_per_slice = num_tiles // n_split

    pred2 = pred.reshape(B, C, HW)
    targ2 = target.reshape(B, C, HW)
    mask2 = mask.reshape(B, 1, HW)

    kernel = functools.partial(
        _masked_l1_kernel, hw=HW, tile=tile,
        tiles_per_slice=tiles_per_slice, ragged=ragged)

    # Explicit VMEM budget: double-buffered inputs + f32 scratch accumulators.
    vmem_est = (2 * (2 * C * tile * in_bytes + tile * mask_bytes)
                + (2 * C + 1) * tile * 4 + (1 << 20))
    vmem_limit = int(min(max(2 * vmem_est, 16 << 20), 40 << 20))

    def in_map(s, b, t):
        return (b, 0, s * tiles_per_slice + t)

    partials = pl.pallas_call(
        kernel,
        out_shape=jax.ShapeDtypeStruct((n_split, B, 3, 128), jnp.float32),
        grid_spec=pltpu.PrefetchScalarGridSpec(
            num_scalar_prefetch=0,
            grid=(n_split, B, tiles_per_slice),
            in_specs=[
                pl.BlockSpec((None, C, tile), in_map),
                pl.BlockSpec((None, C, tile), in_map),
                pl.BlockSpec((None, 1, tile), in_map),
            ],
            out_specs=pl.BlockSpec((None, None, 3, 128),
                                   lambda s, b, t: (s, b, 0, 0)),
            scratch_shapes=[
                pltpu.VMEM((C, tile), jnp.float32),   # sum |p - t|
                pltpu.VMEM((C, tile), jnp.float32),   # sum m * |p - t|
                pltpu.VMEM((1, tile), jnp.float32),   # sum m
            ],
        ),
        compiler_params=pltpu.CompilerParams(
            dimension_semantics=("parallel", "parallel", "arbitrary"),
            vmem_limit_bytes=vmem_limit),
    )(pred2, targ2, mask2)

    # Tiny epilogue: n_split * B * 3 scalars.
    sums = jnp.sum(partials[..., 0], axis=(0, 1))      # (3,)
    sum_d, sum_md, sum_m = sums[0], sums[1], sums[2]
    n_total = jnp.float32(B * HW)

    masked_loss = sum_md / (sum_m + EPS)
    unmasked_loss = (sum_d - sum_md) / ((n_total - sum_m) + EPS)
    return masked_weight * masked_loss + unmasked_weight * unmasked_loss


def _reference_loss(pred, target, mask, masked_weight=10.0, unmasked_weight=0.1):
    pred = pred.astype(jnp.float32)
    target = target.astype(jnp.float32)
    if mask.ndim == 3:
        mask = mask[:, None, :, :]
    if mask.shape[2:] != pred.shape[2:]:
        mask = jax.image.resize(
            mask, (mask.shape[0], mask.shape[1]) + pred.shape[2:],
            method="bilinear", antialias=False)
    mask = mask.astype(jnp.float32)
    ml = jnp.sum(jnp.abs(pred * mask - target * mask)) / (jnp.sum(mask) + EPS)
    inv = 1.0 - mask
    ul = jnp.sum(jnp.abs(pred * inv - target * inv)) / (jnp.sum(inv) + EPS)
    return masked_weight * ml + unmasked_weight * ul


if __name__ == "__main__":
    key = jax.random.PRNGKey(0)
    k1, k2, k3, k4 = jax.random.split(key, 4)

    # Case 1: binary 3-D mask (unsqueeze path), HW == one tile, no ragged tail.
    B, C, H, W = 2, 4, 16, 16
    pred = jax.random.normal(k1, (B, C, H, W), dtype=jnp.float32)
    target = jax.random.normal(k2, (B, C, H, W), dtype=jnp.float32)
    mask = (jax.random.uniform(k3, (B, H, W), dtype=jnp.float32) > 0.5).astype(jnp.float32)
    loss = masked_l1_loss(pred, target, mask)
    jax.block_until_ready(loss)
    ref = _reference_loss(pred, target, mask)
    assert jnp.allclose(loss, ref, rtol=1e-4, atol=1e-4), (loss, ref)

    # Case 2: low-res soft mask (bilinear resize) + ragged tail (HW=400, tile=512).
    H2, W2 = 20, 20
    pred2 = jax.random.normal(k1, (B, C, H2, W2), dtype=jnp.float32)
    target2 = jax.random.normal(k2, (B, C, H2, W2), dtype=jnp.float32)
    mask_lo = jax.random.uniform(k4, (B, 1, 5, 5), dtype=jnp.float32)
    loss2 = masked_l1_loss(pred2, target2, mask_lo)
    jax.block_until_ready(loss2)
    ref2 = _reference_loss(pred2, target2, mask_lo)
    assert jnp.allclose(loss2, ref2, rtol=1e-4, atol=1e-4), (loss2, ref2)

    # Case 3: bf16 streaming, multi-tile grid + core-split path
    # (HW=2304 -> tile=384, 6 tiles, n_split=2), B=1.
    B3, C3, H3, W3 = 1, 4, 48, 48
    pred3 = jax.random.normal(k1, (B3, C3, H3, W3), dtype=jnp.float32).astype(jnp.bfloat16)
    target3 = jax.random.normal(k2, (B3, C3, H3, W3), dtype=jnp.float32).astype(jnp.bfloat16)
    mask3 = (jax.random.uniform(k3, (B3, H3, W3), dtype=jnp.float32) > 0.5).astype(jnp.float32)
    loss3 = masked_l1_loss(pred3, target3, mask3, target_step_bytes=8192)
    jax.block_until_ready(loss3)
    ref3 = _reference_loss(pred3, target3, mask3)
    assert jnp.allclose(loss3, ref3, rtol=1e-3, atol=1e-3), (loss3, ref3)

    # Case 4: multi-tile WITH ragged last tile (HW=2500, tile=512 -> 5 tiles).
    B4, C4, H4, W4 = 2, 3, 50, 50
    pred4 = jax.random.normal(k1, (B4, C4, H4, W4), dtype=jnp.float32)
    target4 = jax.random.normal(k2, (B4, C4, H4, W4), dtype=jnp.float32)
    mask4 = jax.random.uniform(k4, (B4, H4, W4), dtype=jnp.float32)
    loss4 = masked_l1_loss(pred4, target4, mask4, target_step_bytes=8192)
    jax.block_until_ready(loss4)
    ref4 = _reference_loss(pred4, target4, mask4)
    assert jnp.allclose(loss4, ref4, rtol=1e-4, atol=1e-4), (loss4, ref4)

    print("KERNEL_OK")
</pallas_src>

<mosaic_0001>
module attributes {stable_mosaic.version = 11 : i64} {
  func.func @_masked_l1_kernel(%arg0: i32, %arg1: i32, %arg2: i32, %arg3: memref<1x4x256xf32, #tpu.memory_space<vmem>>, %arg4: memref<1x4x256xf32, #tpu.memory_space<vmem>>, %arg5: memref<1x1x256xf32, #tpu.memory_space<vmem>>, %arg6: memref<1x1x3x128xf32, #tpu.memory_space<vmem>>, %arg7: memref<4x256xf32, #tpu.memory_space<vmem>>, %arg8: memref<4x256xf32, #tpu.memory_space<vmem>>, %arg9: memref<1x256xf32, #tpu.memory_space<vmem>>) attributes {dimension_semantics = [#tpu.dimension_semantics<parallel>, #tpu.dimension_semantics<parallel>, #tpu.dimension_semantics<arbitrary>], iteration_bounds = array<i64: 1, 2, 1>, scalar_prefetch = 0 : i64, scratch_operands = 3 : i64, tpu.core_type = #tpu.core_type<tc>, window_params = [{transform_indices = @transform_0, window_bounds = array<i64: 1, 4, 256>}, {transform_indices = @transform_1, window_bounds = array<i64: 1, 4, 256>}, {transform_indices = @transform_2, window_bounds = array<i64: 1, 1, 256>}, {transform_indices = @transform_3, window_bounds = array<i64: 1, 1, 3, 128>}]} {
    %c0 = arith.constant 0 : index
    %c0_0 = arith.constant 0 : index
    %c0_1 = arith.constant 0 : index
    %0 = vector.load %arg3[%c0, %c0_0, %c0_1] : memref<1x4x256xf32, #tpu.memory_space<vmem>>, vector<1x4x256xf32>
    %1 = vector.shape_cast %0 : vector<1x4x256xf32> to vector<4x256xf32>
    %c0_2 = arith.constant 0 : index
    %c0_3 = arith.constant 0 : index
    %c0_4 = arith.constant 0 : index
    %2 = vector.load %arg4[%c0_2, %c0_3, %c0_4] : memref<1x4x256xf32, #tpu.memory_space<vmem>>, vector<1x4x256xf32>
    %3 = vector.shape_cast %2 : vector<1x4x256xf32> to vector<4x256xf32>
    %c0_5 = arith.constant 0 : index
    %c0_6 = arith.constant 0 : index
    %c0_7 = arith.constant 0 : index
    %4 = vector.load %arg5[%c0_5, %c0_6, %c0_7] : memref<1x1x256xf32, #tpu.memory_space<vmem>>, vector<1x1x256xf32>
    %5 = vector.shape_cast %4 : vector<1x1x256xf32> to vector<1x256xf32>
    %6 = arith.subf %1, %3 : vector<4x256xf32>
    %7 = math.absf %6 : vector<4x256xf32>
    %8 = vector.broadcast %5 : vector<1x256xf32> to vector<4x256xf32>
    %9 = arith.mulf %8, %7 : vector<4x256xf32>
    %c0_i32 = arith.constant 0 : i32
    %10 = arith.cmpi eq, %arg2, %c0_i32 : i32
    %11 = arith.extui %10 : i1 to i32
    %c0_i32_8 = arith.constant 0 : i32
    %12 = arith.cmpi ne, %11, %c0_i32_8 : i32
    scf.if %12 {
      %c0_13 = arith.constant 0 : index
      %c0_14 = arith.constant 0 : index
      %19 = vector.load %arg7[%c0_13, %c0_14] : memref<4x256xf32, #tpu.memory_space<vmem>>, vector<4x256xf32>
      tpu.vector_store %arg7[%c0_13, %c0_14], %7 {strides = array<i32>} : memref<4x256xf32, #tpu.memory_space<vmem>>, vector<4x256xf32>,
      %c0_15 = arith.constant 0 : index
      %c0_16 = arith.constant 0 : index
      %20 = vector.load %arg8[%c0_15, %c0_16] : memref<4x256xf32, #tpu.memory_space<vmem>>, vector<4x256xf32>
      tpu.vector_store %arg8[%c0_15, %c0_16], %9 {strides = array<i32>} : memref<4x256xf32, #tpu.memory_space<vmem>>, vector<4x256xf32>,
      %c0_17 = arith.constant 0 : index
      %c0_18 = arith.constant 0 : index
      %21 = vector.load %arg9[%c0_17, %c0_18] : memref<1x256xf32, #tpu.memory_space<vmem>>, vector<1x256xf32>
      tpu.vector_store %arg9[%c0_17, %c0_18], %5 {strides = array<i32>} : memref<1x256xf32, #tpu.memory_space<vmem>>, vector<1x256xf32>,
    } else {
    }
    %c0_i32_9 = arith.constant 0 : i32
    %13 = arith.cmpi sgt, %arg2, %c0_i32_9 : i32
    %14 = arith.extui %13 : i1 to i32
    %c0_i32_10 = arith.constant 0 : i32
    %15 = arith.cmpi ne, %14, %c0_i32_10 : i32
    scf.if %15 {
      %c0_13 = arith.constant 0 : index
      %c0_14 = arith.constant 0 : index
      %19 = vector.load %arg7[%c0_13, %c0_14] : memref<4x256xf32, #tpu.memory_space<vmem>>, vector<4x256xf32>
      %20 = arith.addf %19, %7 : vector<4x256xf32>
      %c0_15 = arith.constant 0 : index
      %c0_16 = arith.constant 0 : index
      %21 = vector.load %arg7[%c0_15, %c0_16] : memref<4x256xf32, #tpu.memory_space<vmem>>, vector<4x256xf32>
      tpu.vector_store %arg7[%c0_15, %c0_16], %20 {strides = array<i32>} : memref<4x256xf32, #tpu.memory_space<vmem>>, vector<4x256xf32>,
      %c0_17 = arith.constant 0 : index
      %c0_18 = arith.constant 0 : index
      %22 = vector.load %arg8[%c0_17, %c0_18] : memref<4x256xf32, #tpu.memory_space<vmem>>, vector<4x256xf32>
      %23 = arith.addf %22, %9 : vector<4x256xf32>
      %c0_19 = arith.constant 0 : index
      %c0_20 = arith.constant 0 : index
      %24 = vector.load %arg8[%c0_19, %c0_20] : memref<4x256xf32, #tpu.memory_space<vmem>>, vector<4x256xf32>
      tpu.vector_store %arg8[%c0_19, %c0_20], %23 {strides = array<i32>} : memref<4x256xf32, #tpu.memory_space<vmem>>, vector<4x256xf32>,
      %c0_21 = arith.constant 0 : index
      %c0_22 = arith.constant 0 : index
      %25 = vector.load %arg9[%c0_21, %c0_22] : memref<1x256xf32, #tpu.memory_space<vmem>>, vector<1x256xf32>
      %26 = arith.addf %25, %5 : vector<1x256xf32>
      %c0_23 = arith.constant 0 : index
      %c0_24 = arith.constant 0 : index
      %27 = vector.load %arg9[%c0_23, %c0_24] : memref<1x256xf32, #tpu.memory_space<vmem>>, vector<1x256xf32>
      tpu.vector_store %arg9[%c0_23, %c0_24], %26 {strides = array<i32>} : memref<1x256xf32, #tpu.memory_space<vmem>>, vector<1x256xf32>,
    } else {
    }
    %c0_i32_11 = arith.constant 0 : i32
    %16 = arith.cmpi eq, %arg2, %c0_i32_11 : i32
    %17 = arith.extui %16 : i1 to i32
    %c0_i32_12 = arith.constant 0 : i32
    %18 = arith.cmpi ne, %17, %c0_i32_12 : i32
    scf.if %18 {
      %c0_13 = arith.constant 0 : index
      %c0_14 = arith.constant 0 : index
      %19 = vector.load %arg7[%c0_13, %c0_14] : memref<4x256xf32, #tpu.memory_space<vmem>>, vector<4x256xf32>
      %20 = vector.shape_cast %19 : vector<4x256xf32> to vector<1x4x256xf32>
      %cst = arith.constant dense<0.000000e+00> : vector<1xf32>
      %21 = vector.multi_reduction <add>, %20, %cst [1, 2] : vector<1x4x256xf32> to vector<1xf32>
      %22 = vector.shape_cast %21 : vector<1xf32> to vector<1x1x1xf32>
      %23 = vector.extract %22[0, 0, 0] : f32 from vector<1x1x1xf32>
      %c0_15 = arith.constant 0 : index
      %c0_16 = arith.constant 0 : index
      %24 = vector.load %arg8[%c0_15, %c0_16] : memref<4x256xf32, #tpu.memory_space<vmem>>, vector<4x256xf32>
      %25 = vector.shape_cast %24 : vector<4x256xf32> to vector<1x4x256xf32>
      %cst_17 = arith.constant dense<0.000000e+00> : vector<1xf32>
      %26 = vector.multi_reduction <add>, %25, %cst_17 [1, 2] : vector<1x4x256xf32> to vector<1xf32>
      %27 = vector.shape_cast %26 : vector<1xf32> to vector<1x1x1xf32>
      %28 = vector.extract %27[0, 0, 0] : f32 from vector<1x1x1xf32>
      %c0_18 = arith.constant 0 : index
      %c0_19 = arith.constant 0 : index
      %29 = vector.load %arg9[%c0_18, %c0_19] : memref<1x256xf32, #tpu.memory_space<vmem>>, vector<1x256xf32>
      %30 = vector.shape_cast %29 : vector<1x256xf32> to vector<1x1x256xf32>
      %cst_20 = arith.constant dense<0.000000e+00> : vector<1xf32>
      %31 = vector.multi_reduction <add>, %30, %cst_20 [1, 2] : vector<1x1x256xf32> to vector<1xf32>
      %32 = vector.shape_cast %31 : vector<1xf32> to vector<1x1x1xf32>
      %33 = vector.extract %32[0, 0, 0] : f32 from vector<1x1x1xf32>
      %34 = vector.broadcast %23 : f32 to vector<1x128xf32>
      %c0_21 = arith.constant 0 : index
      %c0_22 = arith.constant 0 : index
      %c0_23 = arith.constant 0 : index
      %c0_24 = arith.constant 0 : index
      %35 = vector.load %arg6[%c0_21, %c0_22, %c0_23, %c0_24] : memref<1x1x3x128xf32, #tpu.memory_space<vmem>>, vector<1x1x1x128xf32>
      %36 = vector.shape_cast %35 : vector<1x1x1x128xf32> to vector<1x128xf32>
      %37 = vector.shape_cast %34 : vector<1x128xf32> to vector<1x1x1x128xf32>
      tpu.vector_store %arg6[%c0_21, %c0_22, %c0_23, %c0_24], %37 {strides = array<i32>} : memref<1x1x3x128xf32, #tpu.memory_space<vmem>>, vector<1x1x1x128xf32>,
      %38 = vector.broadcast %28 : f32 to vector<1x128xf32>
      %c0_25 = arith.constant 0 : index
      %c0_26 = arith.constant 0 : index
      %c1 = arith.constant 1 : index
      %c0_27 = arith.constant 0 : index
      %39 = vector.load %arg6[%c0_25, %c0_26, %c1, %c0_27] : memref<1x1x3x128xf32, #tpu.memory_space<vmem>>, vector<1x1x1x128xf32>
      %40 = vector.shape_cast %39 : vector<1x1x1x128xf32> to vector<1x128xf32>
      %41 = vector.shape_cast %38 : vector<1x128xf32> to vector<1x1x1x128xf32>
      tpu.vector_store %arg6[%c0_25, %c0_26, %c1, %c0_27], %41 {strides = array<i32>} : memref<1x1x3x128xf32, #tpu.memory_space<vmem>>, vector<1x1x1x128xf32>,
      %42 = vector.broadcast %33 : f32 to vector<1x128xf32>
      %c0_28 = arith.constant 0 : index
      %c0_29 = arith.constant 0 : index
      %c2 = arith.constant 2 : index
      %c0_30 = arith.constant 0 : index
      %43 = vector.load %arg6[%c0_28, %c0_29, %c2, %c0_30] : memref<1x1x3x128xf32, #tpu.memory_space<vmem>>, vector<1x1x1x128xf32>
      %44 = vector.shape_cast %43 : vector<1x1x1x128xf32> to vector<1x128xf32>
      %45 = vector.shape_cast %42 : vector<1x128xf32> to vector<1x1x1x128xf32>
      tpu.vector_store %arg6[%c0_28, %c0_29, %c2, %c0_30], %45 {strides = array<i32>} : memref<1x1x3x128xf32, #tpu.memory_space<vmem>>, vector<1x1x1x128xf32>,
    } else {
    }
    return
  }
  func.func @transform_0(%arg0: i32, %arg1: i32, %arg2: i32) -> (i32, i32, i32) {
    %c1_i32 = arith.constant 1 : i32
    %0 = arith.muli %arg0, %c1_i32 : i32
    %1 = arith.addi %0, %arg2 : i32
    %c0_i32 = arith.constant 0 : i32
    %c0_i32_0 = arith.constant 0 : i32
    return %arg1, %c0_i32, %1 : i32, i32, i32
  }
  func.func @transform_1(%arg0: i32, %arg1: i32, %arg2: i32) -> (i32, i32, i32) {
    %c1_i32 = arith.constant 1 : i32
    %0 = arith.muli %arg0, %c1_i32 : i32
    %1 = arith.addi %0, %arg2 : i32
    %c0_i32 = arith.constant 0 : i32
    %c0_i32_0 = arith.constant 0 : i32
    return %arg1, %c0_i32, %1 : i32, i32, i32
  }
  func.func @transform_2(%arg0: i32, %arg1: i32, %arg2: i32) -> (i32, i32, i32) {
    %c1_i32 = arith.constant 1 : i32
    %0 = arith.muli %arg0, %c1_i32 : i32
    %1 = arith.addi %0, %arg2 : i32
    %c0_i32 = arith.constant 0 : i32
    %c0_i32_0 = arith.constant 0 : i32
    return %arg1, %c0_i32, %1 : i32, i32, i32
  }
  func.func @transform_3(%arg0: i32, %arg1: i32, %arg2: i32) -> (i32, i32, i32, i32) {
    %c0_i32 = arith.constant 0 : i32
    %c0_i32_0 = arith.constant 0 : i32
    %c0_i32_1 = arith.constant 0 : i32
    return %arg0, %arg1, %c0_i32, %c0_i32_0 : i32, i32, i32, i32
  }
}

</mosaic_0001>

<bundles_post_ra>
// kernel: tpu_custom_call.1
= control target key start
LH: loop header
LB: loop body
LE: loop exit
PB: predicated region body
PF: predicated region fallthrough
CT: control target
= control target key end

     0   :  { %8 = vsyncpa [#allocation6], 0  ;;  %s981_s0 = inlined_call_operand.hbm [shape: f32[2,4,256], index: 0, kind: input, shape index: {}]   ;;  %s982_s1 = inlined_call_operand.hbm [shape: f32[2,4,256], index: 1, kind: input, shape index: {}]   ;;  %s983_s2 = inlined_call_operand.vmem [shape: f32[2,1,256], index: 2, kind: input, shape index: {}]   ;;  %s984_s3 = inlined_call_operand.vmem [shape: f32[1,2,3,128], index: 3, kind: output, shape index: {}]  }
   0x1   :  { %10 = vsyncpa [#allocation6 + $0x1], 0 }
   0x2   :  { %11 = vsyncpa [#allocation8], 0 }
   0x3   :  { %13 = vsyncpa [#allocation8 + $0x1], 0  ;;  %s798_s12 = smov 0   ;;  %s800_s13 = smov 0  }
   0x4   :  { %s802_s14 = smov 0   ;;  %s804_s15 = smov 0  }
   0x5   :  { %s806_s16 = smov 0   ;;  %s808_s17 = smov 0  }
   0x6 LB: > { %s574_s18 = sadd.s32 4294967295, %s774_s17   ;;  %s34_s19 = sadd.s32 1, %s770_s16  ;;  %s774_s17 = sphi %s808_s17, %s19_s17   ;;  %s770_s16 = sphi %s806_s16, %s998_s16   ;;  %s766_s15 = sphi %s804_s15, %s997_s15   ;;  %s762_s14 = sphi %s802_s14, %s996_s14   ;;  %s758_s13 = sphi %s800_s13, %s995_s13   ;;  %s754_s12 = sphi %s798_s12, %s994_s12  }
   0x7   : > { %p36_p0 = scmp.ge.s32.totalorder %s34_s19, 2  ;;  %s49_s20 = sadd.s32 1, %s762_s14 }
   0x8   : > { %p56_p1 = scmp.ne.s32.totalorder %s762_s14, %s758_s13  ;;  %p57_p2 = scmp.eq.s32.totalorder %s774_s17, 0 }
   0x9   : > { %s1000_s19 = smov (%p36_p0, %s34_s19), 0  ;;  %p62_p4 = scmp.ne.s32.totalorder %s758_s13, %s754_s12 }
   0xa   : > { %p834_p3 = por %p57_p2, %p56_p1  ;;  %s44_s22 = ssub.s32 %s770_s16, %s1000_s19 }
   0xb   : > { %p63_p5 = scmp.eq.s32.totalorder %s574_s18, 0  ;;  %p47_p6 = scmp.eq.s32.totalorder %s44_s22, 0 }
   0xc   : > { %p611_p8 = scmp.lt.s32.totalorder %s774_s17, 2  ;;  %s850_s25 = sand.u32 1, %s762_s14  }
   0xd   : > { %p841_p7 = por %p63_p5, %p62_p4  ;;  %s591_s26 = sshll.u32 %s770_s16, 7 }
   0xe   : > { %s847_s24 = scalar_select %p47_p6, %s762_s14, %s49_s20  }
   0xf   : > { %s987_s23 = scalar_select %p841_p7, 1, 0 }
  0x10   : > { %s578_s27 = sshll.u32 %s850_s25, 3  ;;  %s859_s30 = scalar_lea.hbm %s981_s0, %s591_s26 }
  0x11   : > { %s178_s4 = scalar_lea.vmem [#allocation5], %s578_s27  ;;  %p865_p9 = pnand %p611_p8, %p834_p3 }
  0x12   : > { %s189_s5 = sshll.u32 %s178_s4, 4  ;;  %s175_s7 = scalar_lea.sflag [#allocation6], %s850_s25  ;;  %s869_s5 = int_to_ptr.vmem [resolvable:$true] %s189_s5 }
  0x13   : > { %s660_s8 = scalar_lea.hbm %s859_s30, 128  ;;  %p662_p13 = pneg %p865_p9 }
  0x14   : > { %p661_p12 = scmp.ne.s32.totalorder %s859_s30, %s660_s8  ;;  %s665_s11 = scalar_lea.hbm %s981_s0, 256 }
  0x15   : > { %p666_p2 = scmp.lt.u32.totalorder %s859_s30, %s981_s0  ;;  %p667_p3 = scmp.lt.u32.totalorder %s665_s11, %s660_s8 }
  0x16   : > { %p663_p0 = pnand %p662_p13, %p661_p12  ;;  %p669_p5 = scmp.lt.u32.totalorder %s660_s8, %s859_s30 }
  0x17   : > { %p668_p4 = por %p667_p3, %p666_p2 }
  0x18   : > { %p664_p1 = pneg %p663_p0 }
  0x19   : > { %p670_p6 = por %p669_p5, %p668_p4 }
  0x1b   : > { %p671_p8 = pnand %p670_p6, %p664_p1 }
  0x1d   : > { %674 = shalt.err (!%p671_p8)
}
  0x1e   : > { %s675_s20 = scalar_lea.vmem %s869_s5, 128  ;;  %s776_s21 = smov [#allocation5]  }
  0x1f   : > { %p676_p12 = scmp.ne.s32.totalorder %s869_s5, %s675_s20  ;;  %s680_s22 = sshll.u32 %s776_s21, 4  ;;  %s681_s22 = int_to_ptr.vmem [resolvable:$false] %s680_s22 }
  0x20   : > { %s682_s28 = scalar_lea.vmem %s681_s22, 256  ;;  %p683_p11 = scmp.lt.s32.totalorder %s869_s5, %s681_s22 }
  0x21   : > { %p678_p0 = pnand %p676_p12, %p662_p13  ;;  %p684_p2 = scmp.lt.s32.totalorder %s682_s28, %s675_s20 }
  0x23   : > { %p679_p10 = pneg %p678_p0  ;;  %p685_p3 = por %p684_p2, %p683_p11 }
  0x25   : > { %p686_p4 = pnand %p685_p3, %p679_p10 }
  0x27   : > { %689 = shalt.err (!%p686_p4)
}
  0x28   : > { %607 = dma.hbm_to_vmem [thread:$0]  (!%p865_p9), %s859_s30, 128, %s869_s5, %s175_s7  }
  0x29   : > { %p989_p1 = scmp.lt.s32.totalorder %s774_s17, 3  ;;  %p990_p5 = scmp.ge.s32.totalorder %s774_s17, 1 }
  0x2a   : > { %s912_s9 = scalar_lea.hbm %s982_s1, %s591_s26  ;;  %s200_s10 = scalar_lea.vmem [#allocation7], %s578_s27 }
  0x2b   : > { %p903_p6 = pnand %p990_p5, %p989_p1  ;;  %s211_s11 = sshll.u32 %s200_s10, 4  ;;  %s212_s11 = int_to_ptr.vmem [resolvable:$true] %s211_s11 }
  0x2c   : > { %s197_s30 = scalar_lea.sflag [#allocation8], %s850_s25  ;;  %s690_s5 = scalar_lea.hbm %s912_s9, 128 }
  0x2d   : > { %s991_s29 = scalar_select %p903_p6, 1, 0 }
  0x2e   : > { %p691_p10 = scmp.ne.s32.totalorder %s912_s9, %s690_s5  ;;  %s695_s26 = scalar_lea.hbm %s982_s1, 256 }
  0x2f   : > { %p696_p12 = scmp.lt.u32.totalorder %s912_s9, %s982_s1  ;;  %p697_p0 = scmp.lt.u32.totalorder %s695_s26, %s690_s5 }
  0x30   : > { %p693_p11 = pnand %p691_p10, %p662_p13  ;;  %p699_p3 = scmp.lt.u32.totalorder %s690_s5, %s912_s9 }
  0x31   : > { %p698_p2 = por %p697_p0, %p696_p12 }
  0x32   : > { %p694_p8 = pneg %p693_p11 }
  0x33   : > { %p700_p4 = por %p699_p3, %p698_p2 }
  0x35   : > { %p701_p1 = pnand %p700_p4, %p694_p8 }
  0x37   : > { %704 = shalt.err (!%p701_p1)
}
  0x38   : > { %s705_s25 = scalar_lea.vmem %s212_s11, 128  ;;  %s777_s27 = smov [#allocation7]  }
  0x39   : > { %p706_p5 = scmp.ne.s32.totalorder %s212_s11, %s705_s25  ;;  %s710_s21 = sshll.u32 %s777_s27, 4  ;;  %s711_s21 = int_to_ptr.vmem [resolvable:$false] %s710_s21 }
  0x3a   : > { %s712_s22 = scalar_lea.vmem %s711_s21, 256  ;;  %p713_p7 = scmp.lt.s32.totalorder %s212_s11, %s711_s21 }
  0x3b   : > { %p708_p10 = pnand %p706_p5, %p662_p13  ;;  %p714_p6 = scmp.lt.s32.totalorder %s712_s22, %s705_s25 }
  0x3d   : > { %p709_p11 = pneg %p708_p10  ;;  %p715_p0 = por %p714_p6, %p713_p7 }
  0x3f   : > { %p716_p12 = pnand %p715_p0, %p709_p11 }
  0x41   : > { %719 = shalt.err (!%p716_p12)
}
  0x42   : > { %610 = dma.hbm_to_vmem [thread:$0]  (!%p865_p9), %s912_s9, 128, %s212_s11, %s197_s30  }
  0x43   : > { %p992_p8 = scmp.ne.s32.totalorder %s991_s29, 0 }
  0x44   : > { %s236_s28 = sand.u32 (!%p992_p8), 1, %s758_s13   ;;  %p993_p13 = scmp.ne.s32.totalorder (!%p992_p8), %s987_s23, 0 }
  0x45   : > { %234 = sbr.rel (%p992_p8) target bundleno = 304 (0x130), region = 32  ;;  %s585_s4 = sshll.u32 (!%p992_p8), %s236_s28, 3 }
  0x46   : > { %s237_s8 = scalar_lea.sflag (!%p992_p8), [#allocation6], %s236_s28  ;;  %s240_s10 = scalar_lea.vmem (!%p992_p8), [#allocation5], %s585_s4 }
  0x4c   : > { %745 = dma.done.wait (%p993_p13), %s237_s8, 128  }
  0x4d   : > { %747 = vsyncadd (%p993_p13), %s237_s8, 4294967168  ;;  %s246_s5 = scalar_lea.sflag [#allocation8], %s236_s28  ;;  %s249_s7 = scalar_lea.vmem [#allocation7], %s585_s4 }
  0x4e   : > { %749 = dma.done.wait (%p993_p13), %s246_s5, 128  }
  0x4f   : > { %751 = vsyncadd (%p993_p13), %s246_s5, 4294967168  ;;  %p295_p7 = scmp.lt.s32.totalorder %s766_s15, 1  ;;  %v318_v0 = vlaneseq  ;;  %v312_v4 = vld [vmem:[%s240_s10] sm:$0xff]  ;;  %v313_v5 = vld [vmem:[%s249_s7] sm:$0xff]  ;;  %vm376_vm1 = vcmask 1043456   ;;  %vm417_vm2 = vcmask 1040384  }
  0x50   : > { %v315_v7 = vsub.f32 %v312_v4, %v313_v5 }
  0x51   : > { %s1002_s15 = smov (!%p295_p7, %s766_s15), 1  ;;  %v319_v1 = vshrl.u32 %v318_v0, 7  ;;  %vm345_vm0 = vcmp.lt.s32.totalorder %v318_v0, 256 }
  0x52   : > { %s587_s6 = sshll.u32 %s1002_s15, 1  ;;  %v316_v9 = vand.u32 2147483647, %v315_v7  ;;  %s588_s23 = sshll.u32 %s1002_s15, 2 }
  0x53   : > { %v320_v2 = vsub.s32 0, %v319_v1  ;;  %s301_s11 = scalar_lea.vmem %s983_s2, %s587_s6  ;;  %v324_v3 = vsub.s32 1, %v319_v1  ;;  %s311_s26 = scalar_lea.vmem %s984_s3, %s588_s23 }
  0x54   : > { %v314_v6 = vld [vmem:[%s301_s11] sm:$0x3]  ;;  %v329_v11 = vcombine.high %v316_v9, %v316_v9  ;;  %v377_v12 = vsel %vm376_vm1, %v316_v9, 0.0 }
  0x55   : > { %347 = vst.msk [vmem:[#allocation4] sm:$0x3] %vm345_vm0, %v314_v6  ;;  %v321_v8 = vrot.slane %v314_v6, %v320_v2  ;;  %v325_v10 = vrot.slane %v314_v6, %v324_v3 }
  0x56   : > { %v378_v14 = vsel %vm376_vm1, %v329_v11, 0.0 }
  0x57   : > { %v331_v13 = vmul.f32 %v321_v8, %v316_v9  ;;  %v332_v15 = vmul.f32 %v329_v11, %v325_v10  ;;  %v379_v16 = vadd.f32 %v378_v14, %v377_v12 }
  0x59   : > { %v340_v20 = vcombine.low %v331_v13, %v332_v15  ;;  %v593_v21 = vcombine.low %v332_v15, %v332_v15  ;;  %380 = vadd.xlane.f32.xlu0 %v379_v16 }
  0x5b   : > { %v393_v24 = vsel %vm376_vm1, %v340_v20, 0.0  ;;  %v394_v25 = vsel %vm376_vm1, %v593_v21, 0.0 }
  0x5c   : > { %v405_v17 = vld [vmem:[#allocation4] sm:$0x3]  ;;  %v395_v27 = vadd.f32 %v394_v25, %v393_v24 }
  0x5d   : > { %v410_v18 = vrot.slane %v405_v17, %v320_v2  ;;  %v414_v19 = vrot.slane %v405_v17, %v324_v3 }
  0x5e   : > { %396 = vadd.xlane.f32.xlu0 %v395_v27 }
  0x5f   : > { %v418_v22 = vsel %vm417_vm2, %v410_v18, 0.0  ;;  %v419_v23 = vsel %vm417_vm2, %v414_v19, 0.0 }
  0x60   : > { %v420_v26 = vadd.f32 %v419_v23, %v418_v22 }
  0x62   : > { %421 = vadd.xlane.f32.xlu1 %v420_v26 }
  0xe6   : > { %v381_v28 = vpop.xlane.xlu0 %380 }
  0xe7   : > { %v382_v29 = vrot.slane %v381_v28, 4 }
  0xe9   : > { %v383_v30 = vadd.f32 %v382_v29, %v381_v28 }
  0xeb   : > { %v397_v32 = vpop.xlane.xlu0 %396  ;;  %v384_v33 = vrot.slane %v383_v30, 2 }
  0xec   : > { %v398_v35 = vrot.slane %v397_v32, 4 }
  0xed   : > { %v385_v38 = vadd.f32 %v384_v33, %v383_v30 }
  0xee   : > { %v399_v37 = vadd.f32 %v398_v35, %v397_v32 }
  0xef   : > { %v422_v31 = vpop.xlane.xlu1 %421  ;;  %v386_v41 = vrot.slane %v385_v38, 1 }
  0xf0   : > { %v423_v34 = vrot.slane %v422_v31, 4  ;;  %v400_v40 = vrot.slane %v399_v37, 2 }
  0xf1   : > { %v387_v44 = vadd.f32 %v386_v41, %v385_v38 }
  0xf2   : > { %v424_v36 = vadd.f32 %v423_v34, %v422_v31  ;;  %v401_v43 = vadd.f32 %v400_v40, %v399_v37 }
  0xf3   : > { %594 = vpush %v387_v44 }
  0xf4   : > { %v425_v39 = vrot.slane %v424_v36, 2  ;;  %v402_v45 = vrot.slane %v401_v43, 1 }
  0xf6   : > { %v426_v42 = vadd.f32 %v425_v39, %v424_v36  ;;  %v403_v47 = vadd.f32 %v402_v45, %v401_v43 }
  0xf8   : > { %v427_v46 = vrot.slane %v426_v42, 1  ;;  %596 = vpush %v403_v47 }
  0xfa   : > { %v428_v48 = vadd.f32 %v427_v46, %v426_v42 }
  0xfc   : > { %598 = vpush %v428_v48 }
 0x124   : > { %s595_s18 = spop %594 }
 0x125   : > { %v430_v49 = vstv %s595_s18 }
 0x126   : > { %431 = vst [vmem:[%s311_s26] sm:$0x1] %v430_v49 }
 0x129   : > { %s597_s20 = spop %596 }
 0x12a   : > { %v432_v50 = vstv %s597_s20 }
 0x12b   : > { %433 = vst [vmem:[%s311_s26 + $0x1] sm:$0x1] %v432_v50 }
 0x12d   : > { %s599_s25 = spop %598 }
 0x12e   : > { %v434_v51 = vstv %s599_s25 }
 0x12f   : > { %435 = vst [vmem:[%s311_s26 + $0x2] sm:$0x1] %v434_v51 }
 0x130 PF: > { %s19_s17 = sadd.s32 1, %s774_s17   ;;  %s994_s12 = smov %s758_s13 }
 0x131   : > { %p16_p9 = scmp.ge.s32.totalorder %s19_s17, 4   ;;  %s995_s13 = smov %s762_s14 }
 0x132   : > { %s996_s14 = smov %s847_s24  ;;  %s997_s15 = smov %s770_s16 }
 0x133   : > { %s998_s16 = smov %s1000_s19  ;;  %18 = sbr.rel (!%p16_p9) target bundleno = 6 (0x6), region = 100 }
 0x13a   :  { %463 = vsyncpa [#allocation6], 1 }
 0x13b   :  { %465 = vsyncpa [#allocation6 + $0x1], 1 }
 0x13c   :  { %466 = vsyncpa [#allocation8], 1 }
 0x13d   :  { %468 = vsyncpa [#allocation8 + $0x1], 1 }

</bundles_post_ra>
